<compile_context>
chip_gen: v6e
topology: v6e:2x2x1
jax: 0.10.0
libtpu: 0.0.40
codegen_flags: <defaults>
</compile_context>

<pallas_src>
import functools

import jax
import jax.numpy as jnp
from jax import lax
from jax.experimental import pallas as pl
from jax.experimental.pallas import tpu as pltpu

EPS = 1e-5
LANES = 128
VMEM_LIMIT_BYTES = 32 * 1024 * 1024          # safe on v5e/v6e (128 MiB) and v7x (64 MiB)
# 3x3 taps, centre tap FIRST so the 1x1 shortcut can reuse columns [0, Cin).
_TAPS = [(1, 1)] + [(kh, kw) for kh in range(3) for kw in range(3) if (kh, kw) != (1, 1)]


def _round_up(x, m):
    return (x + m - 1) // m * m


def _compiler_params():
    return pltpu.CompilerParams(
        dimension_semantics=("parallel",),   # M tiles are independent -> megacore on v7x
        vmem_limit_bytes=VMEM_LIMIT_BYTES,
    )


def _choose_m_tile(m, row_bytes, budget_bytes=8 * 1024 * 1024):
    """Largest M tile whose double-buffered working set stays under budget."""
    mt = budget_bytes // max(2 * row_bytes, 1)
    mt = max(128, min(1024, (mt // 128) * 128))
    return min(mt, _round_up(m, 128))


# ----------------------------------------------------------------------------
# Kernels
# ----------------------------------------------------------------------------
def _matmul_stats_kernel(a_ref, w_ref, y_ref, stats_ref):
    # conv-as-matmul on the MXU (bf16 in, f32 accumulate) + per-tile BN partials
    y = jnp.dot(a_ref[...], w_ref[...], preferred_element_type=jnp.float32)
    y_ref[...] = y
    stats = jnp.concatenate(
        [jnp.sum(y, axis=0, keepdims=True),
         jnp.sum(y * y, axis=0, keepdims=True)], axis=0)
    stats_ref[...] = stats[None, :, :]


def _matmul_stats_ds_kernel(a_ref, w_ref, wds_ref, y_ref, ys_ref, stats_ref):
    # conv1 matmul + fused 1x1 downsample matmul (wds is zero outside the
    # centre-tap rows, so it reuses the same im2col tile) + partials for both.
    a = a_ref[...]
    y = jnp.dot(a, w_ref[...], preferred_element_type=jnp.float32)
    ys = jnp.dot(a, wds_ref[...], preferred_element_type=jnp.float32)
    y_ref[...] = y
    ys_ref[...] = ys
    stats = jnp.concatenate(
        [jnp.sum(y, axis=0, keepdims=True),
         jnp.sum(y * y, axis=0, keepdims=True),
         jnp.sum(ys, axis=0, keepdims=True),
         jnp.sum(ys * ys, axis=0, keepdims=True)], axis=0)
    stats_ref[...] = stats[None, :, :]


def _bn_relu_kernel(y_ref, s_ref, b_ref, o_ref):
    o_ref[...] = jnp.maximum(y_ref[...] * s_ref[...] + b_ref[...], 0.0).astype(o_ref.dtype)


def _bn_add_bn_relu_kernel(y_ref, r_ref, s_ref, b_ref, sr_ref, br_ref, o_ref):
    out = (y_ref[...] * s_ref[...] + b_ref[...]
           + r_ref[...] * sr_ref[...] + br_ref[...])
    o_ref[...] = jnp.maximum(out, 0.0).astype(o_ref.dtype)


# ----------------------------------------------------------------------------
# pallas_call wrappers
# ----------------------------------------------------------------------------
def _matmul_stats(a, w, mt):
    m_pad, k = a.shape
    cp = w.shape[1]
    nt = m_pad // mt
    cost = pl.CostEstimate(
        flops=int(2 * m_pad * k * cp), transcendentals=0,
        bytes_accessed=int(a.size * 2 + w.size * 2 + m_pad * cp * 4 + nt * 2 * cp * 4))
    return pl.pallas_call(
        _matmul_stats_kernel,
        out_shape=(jax.ShapeDtypeStruct((m_pad, cp), jnp.float32),
                   jax.ShapeDtypeStruct((nt, 2, cp), jnp.float32)),
        grid=(nt,),
        in_specs=[pl.BlockSpec((mt, k), lambda i: (i, 0)),
                  pl.BlockSpec((k, cp), lambda i: (0, 0))],
        out_specs=(pl.BlockSpec((mt, cp), lambda i: (i, 0)),
                   pl.BlockSpec((1, 2, cp), lambda i: (i, 0, 0))),
        compiler_params=_compiler_params(),
        cost_estimate=cost,
    )(a, w)


def _matmul_stats_ds(a, w, wds, mt):
    m_pad, k = a.shape
    cp = w.shape[1]
    nt = m_pad // mt
    cost = pl.CostEstimate(
        flops=int(4 * m_pad * k * cp), transcendentals=0,
        bytes_accessed=int(a.size * 2 + w.size * 2 + wds.size * 2
                           + 2 * m_pad * cp * 4 + nt * 4 * cp * 4))
    return pl.pallas_call(
        _matmul_stats_ds_kernel,
        out_shape=(jax.ShapeDtypeStruct((m_pad, cp), jnp.float32),
                   jax.ShapeDtypeStruct((m_pad, cp), jnp.float32),
                   jax.ShapeDtypeStruct((nt, 4, cp), jnp.float32)),
        grid=(nt,),
        in_specs=[pl.BlockSpec((mt, k), lambda i: (i, 0)),
                  pl.BlockSpec((k, cp), lambda i: (0, 0)),
                  pl.BlockSpec((k, cp), lambda i: (0, 0))],
        out_specs=(pl.BlockSpec((mt, cp), lambda i: (i, 0)),
                   pl.BlockSpec((mt, cp), lambda i: (i, 0)),
                   pl.BlockSpec((1, 4, cp), lambda i: (i, 0, 0))),
        compiler_params=_compiler_params(),
        cost_estimate=cost,
    )(a, w, wds)


def _bn_relu(y, scale, bias, mt, out_dtype):
    m_pad, cp = y.shape
    nt = m_pad // mt
    cost = pl.CostEstimate(
        flops=int(2 * m_pad * cp), transcendentals=0,
        bytes_accessed=int(y.size * 4 + 2 * cp * 4
                           + m_pad * cp * jnp.dtype(out_dtype).itemsize))
    return pl.pallas_call(
        _bn_relu_kernel,
        out_shape=jax.ShapeDtypeStruct((m_pad, cp), out_dtype),
        grid=(nt,),
        in_specs=[pl.BlockSpec((mt, cp), lambda i: (i, 0)),
                  pl.BlockSpec((1, cp), lambda i: (0, 0)),
                  pl.BlockSpec((1, cp), lambda i: (0, 0))],
        out_specs=pl.BlockSpec((mt, cp), lambda i: (i, 0)),
        compiler_params=_compiler_params(),
        cost_estimate=cost,
    )(y, scale, bias)


def _bn_add_bn_relu(y, r, scale, bias, scale_r, bias_r, mt):
    m_pad, cp = y.shape
    nt = m_pad // mt
    tile = pl.BlockSpec((mt, cp), lambda i: (i, 0))
    vec = pl.BlockSpec((1, cp), lambda i: (0, 0))
    cost = pl.CostEstimate(
        flops=int(5 * m_pad * cp), transcendentals=0,
        bytes_accessed=int(3 * m_pad * cp * 4 + 4 * cp * 4))
    return pl.pallas_call(
        _bn_add_bn_relu_kernel,
        out_shape=jax.ShapeDtypeStruct((m_pad, cp), jnp.float32),
        grid=(nt,),
        in_specs=[tile, tile, vec, vec, vec, vec],
        out_specs=tile,
        compiler_params=_compiler_params(),
        cost_estimate=cost,
    )(y, r, scale, bias, scale_r, bias_r)


# ----------------------------------------------------------------------------
# Layout plumbing (plain JAX): im2col + weight reshuffling, BN folding
# ----------------------------------------------------------------------------
def _im2col_3x3(x_nhwc, stride):
    """(N,H,W,C) -> (M, 9*C) bf16 patch matrix, centre tap first."""
    n, h, w, c = x_nhwc.shape
    xp = jnp.pad(x_nhwc, ((0, 0), (1, 1), (1, 1), (0, 0)))
    ho = (h + 2 - 3) // stride + 1
    wo = (w + 2 - 3) // stride + 1
    cols = [xp[:, kh:kh + stride * ho:stride, kw:kw + stride * wo:stride, :]
            for kh, kw in _TAPS]
    patches = jnp.concatenate(cols, axis=-1).reshape(n * ho * wo, 9 * c)
    return patches.astype(jnp.bfloat16), (n, ho, wo)


def _conv3x3_to_matrix(w_oihw, cp):
    """torch (Cout,Cin,3,3) -> (9*Cin, cp) bf16, same tap order as _im2col_3x3."""
    cout = w_oihw.shape[0]
    rows = [w_oihw[:, :, kh, kw].T for kh, kw in _TAPS]        # each (Cin, Cout)
    m = jnp.concatenate(rows, axis=0)                          # (9*Cin, Cout)
    return jnp.pad(m, ((0, 0), (0, cp - cout))).astype(jnp.bfloat16)


def _conv1x1_to_fullk_matrix(w_oihw, k, cp):
    """torch (Cout,Cin,1,1) -> (k, cp) bf16: 1x1 weights in the centre-tap rows
    (rows [0, Cin)), zeros elsewhere, so it multiplies conv1's im2col tile."""
    cout, cin = w_oihw.shape[:2]
    m = w_oihw.reshape(cout, cin).T                            # (Cin, Cout)
    m = jnp.pad(m, ((0, k - cin), (0, cp - cout)))
    return m.astype(jnp.bfloat16)


def _fold_bn(col_sum, col_sumsq, count, gamma, beta, cp):
    """Batch-stat BN folded into per-channel scale/bias (padded channels -> 0)."""
    mean = col_sum / count
    var = jnp.maximum(col_sumsq / count - mean * mean, 0.0)    # clamp for safety
    g = jnp.pad(gamma, (0, cp - gamma.shape[0]))
    b = jnp.pad(beta, (0, cp - beta.shape[0]))
    scale = g * lax.rsqrt(var + EPS)
    bias = b - mean * scale
    return scale.reshape(1, cp), bias.reshape(1, cp)


# ----------------------------------------------------------------------------
# ResidualBlock forward (NCHW in / NCHW out)
# ----------------------------------------------------------------------------
def residual_block_forward(x_nchw, params, stride):
    x = jnp.transpose(x_nchw, (0, 2, 3, 1)).astype(jnp.float32)    # -> NHWC
    n, h, w, cin = x.shape
    cout = params["w1"].shape[0]
    cp = _round_up(cout, LANES)
    has_ds = (stride != 1 or cin != cout)

    k1, k2 = 9 * cin, 9 * cout
    ho = (h + 2 - 3) // stride + 1
    wo = (w + 2 - 3) // stride + 1
    m = n * ho * wo

    # One M tile for all passes; budget against the most VMEM-hungry pass.
    row_bytes = max(2 * k1 + (8 if has_ds else 4) * cp,   # conv1 (+ds) matmul
                    2 * k2 + 4 * cp,                      # conv2 matmul
                    12 * cp)                              # normalize + add + relu
    mt = _choose_m_tile(m, row_bytes)
    m_pad = _round_up(m, mt)

    # -------- stage 1: conv1 matmul (+ fused 1x1 shortcut) + BN partials -----
    a1, _ = _im2col_3x3(x, stride)
    a1 = jnp.pad(a1, ((0, m_pad - m), (0, 0)))            # zero rows: sums unaffected
    w1m = _conv3x3_to_matrix(params["w1"], cp)
    if has_ds:
        wdsm = _conv1x1_to_fullk_matrix(params["wds"], k1, cp)
        y1, ys, st = _matmul_stats_ds(a1, w1m, wdsm, mt)
        st = jnp.sum(st, axis=0)                          # (4, cp)
        scale_r, bias_r = _fold_bn(st[2], st[3], m, params["gds"], params["bds"], cp)
        r = ys
    else:
        y1, st = _matmul_stats(a1, w1m, mt)
        st = jnp.sum(st, axis=0)                          # (2, cp)
        r = jnp.pad(x.reshape(m, cin), ((0, m_pad - m), (0, cp - cin)))
        scale_r = jnp.ones((1, cp), jnp.float32)
        bias_r = jnp.zeros((1, cp), jnp.float32)
    scale1, bias1 = _fold_bn(st[0], st[1], m, params["g1"], params["b1"], cp)

    # -------- stage 1 finalize: BN1 + ReLU (lane-dense bf16 for conv2) -------
    out1 = _bn_relu(y1, scale1, bias1, mt, jnp.bfloat16)
    out1 = out1[:m, :cout].reshape(n, ho, wo, cout)

    # -------- stage 2: conv2 matmul + BN partials ----------------------------
    a2, _ = _im2col_3x3(out1, 1)
    a2 = jnp.pad(a2, ((0, m_pad - m), (0, 0)))
    w2m = _conv3x3_to_matrix(params["w2"], cp)
    y2, st2 = _matmul_stats(a2, w2m, mt)
    st2 = jnp.sum(st2, axis=0)
    scale2, bias2 = _fold_bn(st2[0], st2[1], m, params["g2"], params["b2"], cp)

    # -------- stage 2 finalize: BN2 + shortcut(BN) + ReLU --------------------
    out = _bn_add_bn_relu(y2, r, scale2, bias2, scale_r, bias_r, mt)
    out = out[:m, :cout].reshape(n, ho, wo, cout)
    return jnp.transpose(out, (0, 3, 1, 2))               # -> NCHW


# ----------------------------------------------------------------------------
# Pure-JAX references (f32 semantics, and bf16-matmul for tight comparison)
# ----------------------------------------------------------------------------
def _bn_train(y, gamma, beta):
    mean = jnp.mean(y, axis=(0, 1, 2), keepdims=True)
    var = jnp.mean((y - mean) ** 2, axis=(0, 1, 2), keepdims=True)
    return (y - mean) * lax.rsqrt(var + EPS) * gamma + beta


def reference_forward(x_nchw, params, stride, matmul_dtype=jnp.float32):
    x = jnp.transpose(x_nchw, (0, 2, 3, 1)).astype(jnp.float32)
    cin = x.shape[-1]
    cout = params["w1"].shape[0]

    def conv(inp, w_oihw, s, pad):
        w_hwio = jnp.transpose(w_oihw, (2, 3, 1, 0)).astype(matmul_dtype)
        return lax.conv_general_dilated(
            inp.astype(matmul_dtype), w_hwio, (s, s), ((pad, pad), (pad, pad)),
            dimension_numbers=("NHWC", "HWIO", "NHWC"),
            preferred_element_type=jnp.float32)

    out1 = jnp.maximum(_bn_train(conv(x, params["w1"], stride, 1),
                                 params["g1"], params["b1"]), 0.0)
    if matmul_dtype == jnp.bfloat16:
        out1 = out1.astype(jnp.bfloat16).astype(jnp.float32)   # kernel stores out1 as bf16
    out2 = _bn_train(conv(out1, params["w2"], 1, 1), params["g2"], params["b2"])
    if stride != 1 or cin != cout:
        res = _bn_train(conv(x, params["wds"], stride, 0), params["gds"], params["bds"])
    else:
        res = x
    return jnp.transpose(jnp.maximum(out2 + res, 0.0), (0, 3, 1, 2))


# ----------------------------------------------------------------------------
# Deterministic parameter init (shapes from the module __init__)
# ----------------------------------------------------------------------------
def make_params(key, cin, cout, stride):
    ks = jax.random.split(key, 9)
    p = {
        "w1": jax.random.normal(ks[0], (cout, cin, 3, 3), jnp.float32) * 0.1,
        "g1": 1.0 + 0.1 * jax.random.normal(ks[1], (cout,), jnp.float32),
        "b1": 0.1 * jax.random.normal(ks[2], (cout,), jnp.float32),
        "w2": jax.random.normal(ks[3], (cout, cout, 3, 3), jnp.float32) * 0.1,
        "g2": 1.0 + 0.1 * jax.random.normal(ks[4], (cout,), jnp.float32),
        "b2": 0.1 * jax.random.normal(ks[5], (cout,), jnp.float32),
    }
    if stride != 1 or cin != cout:
        p["wds"] = jax.random.normal(ks[6], (cout, cin, 1, 1), jnp.float32) * 0.1
        p["gds"] = 1.0 + 0.1 * jax.random.normal(ks[7], (cout,), jnp.float32),
        p["gds"] = p["gds"][0]  # unpack tuple from trailing comma safety
        p["bds"] = 0.1 * jax.random.normal(ks[8], (cout,), jnp.float32)
    return p


if __name__ == "__main__":
    key = jax.random.PRNGKey(0)
    kx, kp1, kp2 = jax.random.split(key, 3)

    fwd = jax.jit(residual_block_forward, static_argnames="stride")

    # Case 1: downsample path (stride=2, channel expansion 4 -> 8)
    x = jax.random.normal(kx, (2, 4, 16, 16), jnp.float32)          # NCHW
    params_ds = make_params(kp1, cin=4, cout=8, stride=2)
    out_ds = jax.block_until_ready(fwd(x, params_ds, stride=2))
    assert out_ds.shape == (2, 8, 8, 8)
    ref_ds_bf16 = reference_forward(x, params_ds, 2, matmul_dtype=jnp.bfloat16)
    ref_ds_f32 = reference_forward(x, params_ds, 2, matmul_dtype=jnp.float32)
    assert jnp.allclose(out_ds, ref_ds_bf16, atol=5e-3, rtol=5e-3), "ds: bf16-ref mismatch"
    assert jnp.allclose(out_ds, ref_ds_f32, atol=1e-1, rtol=1e-1), "ds: f32-ref mismatch"

    # Case 2: identity shortcut (stride=1, channels preserved 4 -> 4)
    params_id = make_params(kp2, cin=4, cout=4, stride=1)
    out_id = jax.block_until_ready(fwd(x, params_id, stride=1))
    assert out_id.shape == (2, 4, 16, 16)
    ref_id_bf16 = reference_forward(x, params_id, 1, matmul_dtype=jnp.bfloat16)
    ref_id_f32 = reference_forward(x, params_id, 1, matmul_dtype=jnp.float32)
    assert jnp.allclose(out_id, ref_id_bf16, atol=5e-3, rtol=5e-3), "id: bf16-ref mismatch"
    assert jnp.allclose(out_id, ref_id_f32, atol=1e-1, rtol=1e-1), "id: f32-ref mismatch"

    print("KERNEL_OK")
</pallas_src>

<mosaic_0001>
module attributes {stable_mosaic.version = 11 : i64} {
  func.func @_bn_relu_kernel(%arg0: i32, %arg1: memref<128x128xf32, #tpu.memory_space<vmem>>, %arg2: memref<1x128xf32, #tpu.memory_space<vmem>>, %arg3: memref<1x128xf32, #tpu.memory_space<vmem>>, %arg4: memref<128x128xbf16, #tpu.memory_space<vmem>>) attributes {dimension_semantics = [#tpu.dimension_semantics<parallel>], iteration_bounds = array<i64: 1>, scalar_prefetch = 0 : i64, scratch_operands = 0 : i64, tpu.core_type = #tpu.core_type<tc>, window_params = [{transform_indices = @transform_0, window_bounds = array<i64: 128, 128>}, {pipeline_mode = #tpu.pipeline_mode<synchronous>, transform_indices = @transform_1, window_bounds = array<i64: 1, 128>}, {pipeline_mode = #tpu.pipeline_mode<synchronous>, transform_indices = @transform_2, window_bounds = array<i64: 1, 128>}, {transform_indices = @transform_3, window_bounds = array<i64: 128, 128>}]} {
    %c0 = arith.constant 0 : index
    %c0_0 = arith.constant 0 : index
    %0 = vector.load %arg1[%c0, %c0_0] : memref<128x128xf32, #tpu.memory_space<vmem>>, vector<128x128xf32>
    %c0_1 = arith.constant 0 : index
    %c0_2 = arith.constant 0 : index
    %1 = vector.load %arg2[%c0_1, %c0_2] : memref<1x128xf32, #tpu.memory_space<vmem>>, vector<1x128xf32>
    %2 = vector.broadcast %1 : vector<1x128xf32> to vector<128x128xf32>
    %3 = arith.mulf %0, %2 : vector<128x128xf32>
    %c0_3 = arith.constant 0 : index
    %c0_4 = arith.constant 0 : index
    %4 = vector.load %arg3[%c0_3, %c0_4] : memref<1x128xf32, #tpu.memory_space<vmem>>, vector<1x128xf32>
    %5 = vector.broadcast %4 : vector<1x128xf32> to vector<128x128xf32>
    %6 = arith.addf %3, %5 : vector<128x128xf32>
    %cst = arith.constant 0.000000e+00 : f32
    %7 = vector.broadcast %cst : f32 to vector<128x128xf32>
    %8 = arith.maximumf %6, %7 : vector<128x128xf32>
    %9 = arith.truncf %8 : vector<128x128xf32> to vector<128x128xbf16>
    %c0_5 = arith.constant 0 : index
    %c0_6 = arith.constant 0 : index
    %10 = vector.load %arg4[%c0_5, %c0_6] : memref<128x128xbf16, #tpu.memory_space<vmem>>, vector<128x128xbf16>
    tpu.vector_store %arg4[%c0_5, %c0_6], %9 {strides = array<i32>} : memref<128x128xbf16, #tpu.memory_space<vmem>>, vector<128x128xbf16>,
    return
  }
  func.func @transform_0(%arg0: i32) -> (i32, i32) {
    %c0_i32 = arith.constant 0 : i32
    %c0_i32_0 = arith.constant 0 : i32
    return %arg0, %c0_i32 : i32, i32
  }
  func.func @transform_1(%arg0: i32) -> (i32, i32) {
    %c0_i32 = arith.constant 0 : i32
    %c0_i32_0 = arith.constant 0 : i32
    %c0_i32_1 = arith.constant 0 : i32
    return %c0_i32, %c0_i32_0 : i32, i32
  }
  func.func @transform_2(%arg0: i32) -> (i32, i32) {
    %c0_i32 = arith.constant 0 : i32
    %c0_i32_0 = arith.constant 0 : i32
    %c0_i32_1 = arith.constant 0 : i32
    return %c0_i32, %c0_i32_0 : i32, i32
  }
  func.func @transform_3(%arg0: i32) -> (i32, i32) {
    %c0_i32 = arith.constant 0 : i32
    %c0_i32_0 = arith.constant 0 : i32
    return %arg0, %c0_i32 : i32, i32
  }
}

module attributes {stable_mosaic.version = 11 : i64} {
  func.func @_matmul_stats_ds_kernel(%arg0: i32, %arg1: memref<128x36xbf16, #tpu.memory_space<vmem>>, %arg2: memref<36x128xbf16, #tpu.memory_space<vmem>>, %arg3: memref<36x128xbf16, #tpu.memory_space<vmem>>, %arg4: memref<128x128xf32, #tpu.memory_space<vmem>>, %arg5: memref<128x128xf32, #tpu.memory_space<vmem>>, %arg6: memref<1x4x128xf32, #tpu.memory_space<vmem>>) attributes {dimension_semantics = [#tpu.dimension_semantics<parallel>], iteration_bounds = array<i64: 1>, scalar_prefetch = 0 : i64, scratch_operands = 0 : i64, tpu.core_type = #tpu.core_type<tc>, window_params = [{transform_indices = @transform_0, window_bounds = array<i64: 128, 36>}, {pipeline_mode = #tpu.pipeline_mode<synchronous>, transform_indices = @transform_1, window_bounds = array<i64: 36, 128>}, {pipeline_mode = #tpu.pipeline_mode<synchronous>, transform_indices = @transform_2, window_bounds = array<i64: 36, 128>}, {transform_indices = @transform_3, window_bounds = array<i64: 128, 128>}, {transform_indices = @transform_4, window_bounds = array<i64: 128, 128>}, {transform_indices = @transform_5, window_bounds = array<i64: 1, 4, 128>}]} {
    %c0 = arith.constant 0 : index
    %c0_0 = arith.constant 0 : index
    %0 = vector.load %arg1[%c0, %c0_0] : memref<128x36xbf16, #tpu.memory_space<vmem>>, vector<128x36xbf16>
    %c0_1 = arith.constant 0 : index
    %c0_2 = arith.constant 0 : index
    %1 = vector.load %arg2[%c0_1, %c0_2] : memref<36x128xbf16, #tpu.memory_space<vmem>>, vector<36x128xbf16>
    %cst = arith.constant dense<0.000000e+00> : vector<128x128xf32>
    %2 = tpu.matmul %0, %1, %cst {dimension_numbers = #tpu.dot_dimension_numbers<[1], [0], [0], [1], [0, 0, 1, 1], [], []>} : vector<128x36xbf16>, vector<36x128xbf16>, vector<128x128xf32> -> vector<128x128xf32>
    %c0_3 = arith.constant 0 : index
    %c0_4 = arith.constant 0 : index
    %3 = vector.load %arg3[%c0_3, %c0_4] : memref<36x128xbf16, #tpu.memory_space<vmem>>, vector<36x128xbf16>
    %cst_5 = arith.constant dense<0.000000e+00> : vector<128x128xf32>
    %4 = tpu.matmul %0, %3, %cst_5 {dimension_numbers = #tpu.dot_dimension_numbers<[1], [0], [0], [1], [0, 0, 1, 1], [], []>} : vector<128x36xbf16>, vector<36x128xbf16>, vector<128x128xf32> -> vector<128x128xf32>
    %c0_6 = arith.constant 0 : index
    %c0_7 = arith.constant 0 : index
    %5 = vector.load %arg4[%c0_6, %c0_7] : memref<128x128xf32, #tpu.memory_space<vmem>>, vector<128x128xf32>
    tpu.vector_store %arg4[%c0_6, %c0_7], %2 {strides = array<i32>} : memref<128x128xf32, #tpu.memory_space<vmem>>, vector<128x128xf32>,
    %c0_8 = arith.constant 0 : index
    %c0_9 = arith.constant 0 : index
    %6 = vector.load %arg5[%c0_8, %c0_9] : memref<128x128xf32, #tpu.memory_space<vmem>>, vector<128x128xf32>
    tpu.vector_store %arg5[%c0_8, %c0_9], %4 {strides = array<i32>} : memref<128x128xf32, #tpu.memory_space<vmem>>, vector<128x128xf32>,
    %cst_10 = arith.constant dense<0.000000e+00> : vector<128xf32>
    %7 = vector.multi_reduction <add>, %2, %cst_10 [0] : vector<128x128xf32> to vector<128xf32>
    %8 = vector.shape_cast %7 : vector<128xf32> to vector<1x128xf32>
    %9 = arith.mulf %2, %2 : vector<128x128xf32>
    %cst_11 = arith.constant dense<0.000000e+00> : vector<128xf32>
    %10 = vector.multi_reduction <add>, %9, %cst_11 [0] : vector<128x128xf32> to vector<128xf32>
    %11 = vector.shape_cast %10 : vector<128xf32> to vector<1x128xf32>
    %cst_12 = arith.constant dense<0.000000e+00> : vector<128xf32>
    %12 = vector.multi_reduction <add>, %4, %cst_12 [0] : vector<128x128xf32> to vector<128xf32>
    %13 = vector.shape_cast %12 : vector<128xf32> to vector<1x128xf32>
    %14 = arith.mulf %4, %4 : vector<128x128xf32>
    %cst_13 = arith.constant dense<0.000000e+00> : vector<128xf32>
    %15 = vector.multi_reduction <add>, %14, %cst_13 [0] : vector<128x128xf32> to vector<128xf32>
    %16 = vector.shape_cast %15 : vector<128xf32> to vector<1x128xf32>
    %17 = tpu.concatenate %8, %11, %13, %16 in 0 : vector<1x128xf32>, vector<1x128xf32>, vector<1x128xf32>, vector<1x128xf32> -> vector<4x128xf32>
    %18 = vector.shape_cast %17 : vector<4x128xf32> to vector<1x4x128xf32>
    %c0_14 = arith.constant 0 : index
    %c0_15 = arith.constant 0 : index
    %c0_16 = arith.constant 0 : index
    %19 = vector.load %arg6[%c0_14, %c0_15, %c0_16] : memref<1x4x128xf32, #tpu.memory_space<vmem>>, vector<1x4x128xf32>
    tpu.vector_store %arg6[%c0_14, %c0_15, %c0_16], %18 {strides = array<i32>} : memref<1x4x128xf32, #tpu.memory_space<vmem>>, vector<1x4x128xf32>,
    return
  }
  func.func @transform_0(%arg0: i32) -> (i32, i32) {
    %c0_i32 = arith.constant 0 : i32
    %c0_i32_0 = arith.constant 0 : i32
    return %arg0, %c0_i32 : i32, i32
  }
  func.func @transform_1(%arg0: i32) -> (i32, i32) {
    %c0_i32 = arith.constant 0 : i32
    %c0_i32_0 = arith.constant 0 : i32
    %c0_i32_1 = arith.constant 0 : i32
    return %c0_i32, %c0_i32_0 : i32, i32
  }
  func.func @transform_2(%arg0: i32) -> (i32, i32) {
    %c0_i32 = arith.constant 0 : i32
    %c0_i32_0 = arith.constant 0 : i32
    %c0_i32_1 = arith.constant 0 : i32
    return %c0_i32, %c0_i32_0 : i32, i32
  }
  func.func @transform_3(%arg0: i32) -> (i32, i32) {
    %c0_i32 = arith.constant 0 : i32
    %c0_i32_0 = arith.constant 0 : i32
    return %arg0, %c0_i32 : i32, i32
  }
  func.func @transform_4(%arg0: i32) -> (i32, i32) {
    %c0_i32 = arith.constant 0 : i32
    %c0_i32_0 = arith.constant 0 : i32
    return %arg0, %c0_i32 : i32, i32
  }
  func.func @transform_5(%arg0: i32) -> (i32, i32, i32) {
    %c0_i32 = arith.constant 0 : i32
    %c0_i32_0 = arith.constant 0 : i32
    %c0_i32_1 = arith.constant 0 : i32
    return %arg0, %c0_i32, %c0_i32_0 : i32, i32, i32
  }
}

module attributes {stable_mosaic.version = 11 : i64} {
  func.func @_bn_add_bn_relu_kernel(%arg0: i32, %arg1: memref<128x128xf32, #tpu.memory_space<vmem>>, %arg2: memref<128x128xf32, #tpu.memory_space<vmem>>, %arg3: memref<1x128xf32, #tpu.memory_space<vmem>>, %arg4: memref<1x128xf32, #tpu.memory_space<vmem>>, %arg5: memref<1x128xf32, #tpu.memory_space<vmem>>, %arg6: memref<1x128xf32, #tpu.memory_space<vmem>>, %arg7: memref<128x128xf32, #tpu.memory_space<vmem>>) attributes {dimension_semantics = [#tpu.dimension_semantics<parallel>], iteration_bounds = array<i64: 1>, scalar_prefetch = 0 : i64, scratch_operands = 0 : i64, tpu.core_type = #tpu.core_type<tc>, window_params = [{transform_indices = @transform_0, window_bounds = array<i64: 128, 128>}, {transform_indices = @transform_1, window_bounds = array<i64: 128, 128>}, {pipeline_mode = #tpu.pipeline_mode<synchronous>, transform_indices = @transform_2, window_bounds = array<i64: 1, 128>}, {pipeline_mode = #tpu.pipeline_mode<synchronous>, transform_indices = @transform_3, window_bounds = array<i64: 1, 128>}, {pipeline_mode = #tpu.pipeline_mode<synchronous>, transform_indices = @transform_4, window_bounds = array<i64: 1, 128>}, {pipeline_mode = #tpu.pipeline_mode<synchronous>, transform_indices = @transform_5, window_bounds = array<i64: 1, 128>}, {transform_indices = @transform_6, window_bounds = array<i64: 128, 128>}]} {
    %c0 = arith.constant 0 : index
    %c0_0 = arith.constant 0 : index
    %0 = vector.load %arg1[%c0, %c0_0] : memref<128x128xf32, #tpu.memory_space<vmem>>, vector<128x128xf32>
    %c0_1 = arith.constant 0 : index
    %c0_2 = arith.constant 0 : index
    %1 = vector.load %arg3[%c0_1, %c0_2] : memref<1x128xf32, #tpu.memory_space<vmem>>, vector<1x128xf32>
    %2 = vector.broadcast %1 : vector<1x128xf32> to vector<128x128xf32>
    %3 = arith.mulf %0, %2 : vector<128x128xf32>
    %c0_3 = arith.constant 0 : index
    %c0_4 = arith.constant 0 : index
    %4 = vector.load %arg4[%c0_3, %c0_4] : memref<1x128xf32, #tpu.memory_space<vmem>>, vector<1x128xf32>
    %5 = vector.broadcast %4 : vector<1x128xf32> to vector<128x128xf32>
    %6 = arith.addf %3, %5 : vector<128x128xf32>
    %c0_5 = arith.constant 0 : index
    %c0_6 = arith.constant 0 : index
    %7 = vector.load %arg2[%c0_5, %c0_6] : memref<128x128xf32, #tpu.memory_space<vmem>>, vector<128x128xf32>
    %c0_7 = arith.constant 0 : index
    %c0_8 = arith.constant 0 : index
    %8 = vector.load %arg5[%c0_7, %c0_8] : memref<1x128xf32, #tpu.memory_space<vmem>>, vector<1x128xf32>
    %9 = vector.broadcast %8 : vector<1x128xf32> to vector<128x128xf32>
    %10 = arith.mulf %7, %9 : vector<128x128xf32>
    %11 = arith.addf %6, %10 : vector<128x128xf32>
    %c0_9 = arith.constant 0 : index
    %c0_10 = arith.constant 0 : index
    %12 = vector.load %arg6[%c0_9, %c0_10] : memref<1x128xf32, #tpu.memory_space<vmem>>, vector<1x128xf32>
    %13 = vector.broadcast %12 : vector<1x128xf32> to vector<128x128xf32>
    %14 = arith.addf %11, %13 : vector<128x128xf32>
    %cst = arith.constant 0.000000e+00 : f32
    %15 = vector.broadcast %cst : f32 to vector<128x128xf32>
    %16 = arith.maximumf %14, %15 : vector<128x128xf32>
    %c0_11 = arith.constant 0 : index
    %c0_12 = arith.constant 0 : index
    %17 = vector.load %arg7[%c0_11, %c0_12] : memref<128x128xf32, #tpu.memory_space<vmem>>, vector<128x128xf32>
    tpu.vector_store %arg7[%c0_11, %c0_12], %16 {strides = array<i32>} : memref<128x128xf32, #tpu.memory_space<vmem>>, vector<128x128xf32>,
    return
  }
  func.func @transform_0(%arg0: i32) -> (i32, i32) {
    %c0_i32 = arith.constant 0 : i32
    %c0_i32_0 = arith.constant 0 : i32
    return %arg0, %c0_i32 : i32, i32
  }
  func.func @transform_1(%arg0: i32) -> (i32, i32) {
    %c0_i32 = arith.constant 0 : i32
    %c0_i32_0 = arith.constant 0 : i32
    return %arg0, %c0_i32 : i32, i32
  }
  func.func @transform_2(%arg0: i32) -> (i32, i32) {
    %c0_i32 = arith.constant 0 : i32
    %c0_i32_0 = arith.constant 0 : i32
    %c0_i32_1 = arith.constant 0 : i32
    return %c0_i32, %c0_i32_0 : i32, i32
  }
  func.func @transform_3(%arg0: i32) -> (i32, i32) {
    %c0_i32 = arith.constant 0 : i32
    %c0_i32_0 = arith.constant 0 : i32
    %c0_i32_1 = arith.constant 0 : i32
    return %c0_i32, %c0_i32_0 : i32, i32
  }
  func.func @transform_4(%arg0: i32) -> (i32, i32) {
    %c0_i32 = arith.constant 0 : i32
    %c0_i32_0 = arith.constant 0 : i32
    %c0_i32_1 = arith.constant 0 : i32
    return %c0_i32, %c0_i32_0 : i32, i32
  }
  func.func @transform_5(%arg0: i32) -> (i32, i32) {
    %c0_i32 = arith.constant 0 : i32
    %c0_i32_0 = arith.constant 0 : i32
    %c0_i32_1 = arith.constant 0 : i32
    return %c0_i32, %c0_i32_0 : i32, i32
  }
  func.func @transform_6(%arg0: i32) -> (i32, i32) {
    %c0_i32 = arith.constant 0 : i32
    %c0_i32_0 = arith.constant 0 : i32
    return %arg0, %c0_i32 : i32, i32
  }
}

module attributes {stable_mosaic.version = 11 : i64} {
  func.func @_matmul_stats_kernel(%arg0: i32, %arg1: memref<128x72xbf16, #tpu.memory_space<vmem>>, %arg2: memref<72x128xbf16, #tpu.memory_space<vmem>>, %arg3: memref<128x128xf32, #tpu.memory_space<vmem>>, %arg4: memref<1x2x128xf32, #tpu.memory_space<vmem>>) attributes {dimension_semantics = [#tpu.dimension_semantics<parallel>], iteration_bounds = array<i64: 1>, scalar_prefetch = 0 : i64, scratch_operands = 0 : i64, tpu.core_type = #tpu.core_type<tc>, window_params = [{transform_indices = @transform_0, window_bounds = array<i64: 128, 72>}, {pipeline_mode = #tpu.pipeline_mode<synchronous>, transform_indices = @transform_1, window_bounds = array<i64: 72, 128>}, {transform_indices = @transform_2, window_bounds = array<i64: 128, 128>}, {transform_indices = @transform_3, window_bounds = array<i64: 1, 2, 128>}]} {
    %c0 = arith.constant 0 : index
    %c0_0 = arith.constant 0 : index
    %0 = vector.load %arg1[%c0, %c0_0] : memref<128x72xbf16, #tpu.memory_space<vmem>>, vector<128x72xbf16>
    %c0_1 = arith.constant 0 : index
    %c0_2 = arith.constant 0 : index
    %1 = vector.load %arg2[%c0_1, %c0_2] : memref<72x128xbf16, #tpu.memory_space<vmem>>, vector<72x128xbf16>
    %cst = arith.constant dense<0.000000e+00> : vector<128x128xf32>
    %2 = tpu.matmul %0, %1, %cst {dimension_numbers = #tpu.dot_dimension_numbers<[1], [0], [0], [1], [0, 0, 1, 1], [], []>} : vector<128x72xbf16>, vector<72x128xbf16>, vector<128x128xf32> -> vector<128x128xf32>
    %c0_3 = arith.constant 0 : index
    %c0_4 = arith.constant 0 : index
    %3 = vector.load %arg3[%c0_3, %c0_4] : memref<128x128xf32, #tpu.memory_space<vmem>>, vector<128x128xf32>
    tpu.vector_store %arg3[%c0_3, %c0_4], %2 {strides = array<i32>} : memref<128x128xf32, #tpu.memory_space<vmem>>, vector<128x128xf32>,
    %cst_5 = arith.constant dense<0.000000e+00> : vector<128xf32>
    %4 = vector.multi_reduction <add>, %2, %cst_5 [0] : vector<128x128xf32> to vector<128xf32>
    %5 = vector.shape_cast %4 : vector<128xf32> to vector<1x128xf32>
    %6 = arith.mulf %2, %2 : vector<128x128xf32>
    %cst_6 = arith.constant dense<0.000000e+00> : vector<128xf32>
    %7 = vector.multi_reduction <add>, %6, %cst_6 [0] : vector<128x128xf32> to vector<128xf32>
    %8 = vector.shape_cast %7 : vector<128xf32> to vector<1x128xf32>
    %9 = tpu.concatenate %5, %8 in 0 : vector<1x128xf32>, vector<1x128xf32> -> vector<2x128xf32>
    %10 = vector.shape_cast %9 : vector<2x128xf32> to vector<1x2x128xf32>
    %c0_7 = arith.constant 0 : index
    %c0_8 = arith.constant 0 : index
    %c0_9 = arith.constant 0 : index
    %11 = vector.load %arg4[%c0_7, %c0_8, %c0_9] : memref<1x2x128xf32, #tpu.memory_space<vmem>>, vector<1x2x128xf32>
    tpu.vector_store %arg4[%c0_7, %c0_8, %c0_9], %10 {strides = array<i32>} : memref<1x2x128xf32, #tpu.memory_space<vmem>>, vector<1x2x128xf32>,
    return
  }
  func.func @transform_0(%arg0: i32) -> (i32, i32) {
    %c0_i32 = arith.constant 0 : i32
    %c0_i32_0 = arith.constant 0 : i32
    return %arg0, %c0_i32 : i32, i32
  }
  func.func @transform_1(%arg0: i32) -> (i32, i32) {
    %c0_i32 = arith.constant 0 : i32
    %c0_i32_0 = arith.constant 0 : i32
    %c0_i32_1 = arith.constant 0 : i32
    return %c0_i32, %c0_i32_0 : i32, i32
  }
  func.func @transform_2(%arg0: i32) -> (i32, i32) {
    %c0_i32 = arith.constant 0 : i32
    %c0_i32_0 = arith.constant 0 : i32
    return %arg0, %c0_i32 : i32, i32
  }
  func.func @transform_3(%arg0: i32) -> (i32, i32, i32) {
    %c0_i32 = arith.constant 0 : i32
    %c0_i32_0 = arith.constant 0 : i32
    %c0_i32_1 = arith.constant 0 : i32
    return %arg0, %c0_i32, %c0_i32_0 : i32, i32, i32
  }
}

</mosaic_0001>

<bundles_post_ra>
// kernel: residual_block_forward.5
= control target key start
LH: loop header
LB: loop body
LE: loop exit
PB: predicated region body
PF: predicated region fallthrough
CT: control target
= control target key end

     0   :  { %s391_s0 = inlined_call_operand.vmem [shape: f32[128,128], index: 0, kind: input, shape index: {}]   ;;  %s392_s1 = inlined_call_operand.vmem [shape: f32[1,128], index: 1, kind: input, shape index: {}]   ;;  %s393_s2 = inlined_call_operand.vmem [shape: f32[1,128], index: 2, kind: input, shape index: {}]   ;;  %s394_s3 = inlined_call_operand.vmem [shape: bf16[128,128], index: 3, kind: output, shape index: {}]  }
   0x1   :  { %v14_v0 = vld [vmem:[%s391_s0] sm:$0xff]  ;;  %v15_v1 = vld [vmem:[%s391_s0 + $0x8] sm:$0xff]  ;;  %v16_v6 = vld [vmem:[%s391_s0 + $0x10] sm:$0xff] }
   0x2   :  { %v286_v2 = vld [vmem:[%s392_s1] ss:$0 sm:$0xff]  ;;  %v17_v7 = vld [vmem:[%s391_s0 + $0x18] sm:$0xff]  ;;  %v19_v11 = vld [vmem:[%s391_s0 + $0x28] sm:$0xff] }
   0x3   :  { %v37_v3 = vmul.f32 %v286_v2, %v14_v0  ;;  %v38_v4 = vmul.f32 %v286_v2, %v15_v1  ;;  %v293_v5 = vld [vmem:[%s393_s2] ss:$0 sm:$0xff]  ;;  %v39_v8 = vmul.f32 %v286_v2, %v16_v6  ;;  %v40_v9 = vmul.f32 %v286_v2, %v17_v7  ;;  %v20_v12 = vld [vmem:[%s391_s0 + $0x30] sm:$0xff]  ;;  %v21_v17 = vld [vmem:[%s391_s0 + $0x38] sm:$0xff] }
   0x4   :  { %v18_v10 = vld [vmem:[%s391_s0 + $0x20] sm:$0xff]  ;;  %v42_v16 = vmul.f32 %v286_v2, %v19_v11  ;;  %v43_v20 = vmul.f32 %v286_v2, %v20_v12  ;;  %v44_v21 = vmul.f32 %v286_v2, %v21_v17  ;;  %v23_v27 = vld [vmem:[%s391_s0 + $0x48] sm:$0xff]  ;;  %v24_v32 = vld [vmem:[%s391_s0 + $0x50] sm:$0xff] }
   0x5   :  { %v60_v13 = vadd.f32 %v293_v5, %v37_v3  ;;  %v61_v14 = vadd.f32 %v293_v5, %v38_v4  ;;  %v41_v15 = vmul.f32 %v286_v2, %v18_v10  ;;  %v62_v18 = vadd.f32 %v293_v5, %v39_v8  ;;  %v22_v22 = vld [vmem:[%s391_s0 + $0x40] sm:$0xff]  ;;  %v25_v33 = vld [vmem:[%s391_s0 + $0x58] sm:$0xff]  ;;  %v27_v39 = vld [vmem:[%s391_s0 + $0x68] sm:$0xff] }
   0x6   :  { %v63_v19 = vadd.f32 %v293_v5, %v40_v9  ;;  %v65_v26 = vadd.f32 %v293_v5, %v42_v16  ;;  %v66_v30 = vadd.f32 %v293_v5, %v43_v20  ;;  %v67_v31 = vadd.f32 %v293_v5, %v44_v21  ;;  %v26_v38 = vld [vmem:[%s391_s0 + $0x60] sm:$0xff]  ;;  %v28_v44 = vld [vmem:[%s391_s0 + $0x70] sm:$0xff]  ;;  %v29_v49 = vld [vmem:[%s391_s0 + $0x78] sm:$0xff] }
   0x7   :  { %v76_v23 = vmax.f32 %v60_v13, 0.0  ;;  %v77_v24 = vmax.f32 %v61_v14, 0.0  ;;  %v64_v25 = vadd.f32 %v293_v5, %v41_v15  ;;  %v78_v28 = vmax.f32 %v62_v18, 0.0 }
   0x8   :  { %v79_v29 = vmax.f32 %v63_v19, 0.0  ;;  %v81_v36 = vmax.f32 %v65_v26, 0.0  ;;  %v45_v37 = vmul.f32 %v286_v2, %v22_v22  ;;  %v82_v41 = vmax.f32 %v66_v30, 0.0 }
   0x9   :  { %v213_v34 = vpack.c.bf16 %v77_v24, %v76_v23  ;;  %v80_v35 = vmax.f32 %v64_v25, 0.0  ;;  %v83_v42 = vmax.f32 %v67_v31, 0.0  ;;  %v46_v43 = vmul.f32 %v286_v2, %v23_v27 }
   0xa   :  { %v218_v40 = vpack.c.bf16 %v79_v29, %v78_v28  ;;  %v68_v46 = vadd.f32 %v293_v5, %v45_v37  ;;  %v47_v47 = vmul.f32 %v286_v2, %v24_v32  ;;  %v48_v48 = vmul.f32 %v286_v2, %v25_v33 }
   0xb   :  { %214 = vst [vmem:[%s394_s3] sm:$0xff] %v213_v34   ;;  %v223_v45 = vpack.c.bf16 %v81_v36, %v80_v35  ;;  %v228_v50 = vpack.c.bf16 %v83_v42, %v82_v41  ;;  %v69_v51 = vadd.f32 %v293_v5, %v46_v43  ;;  %v49_v52 = vmul.f32 %v286_v2, %v26_v38 }
   0xc   :  { %250 = vst [vmem:[%s394_s3 + $0x8] sm:$0xff] %v218_v40   ;;  %v50_v53 = vmul.f32 %v286_v2, %v27_v39  ;;  %v84_v54 = vmax.f32 %v68_v46, 0.0  ;;  %v70_v55 = vadd.f32 %v293_v5, %v47_v47  ;;  %v71_v56 = vadd.f32 %v293_v5, %v48_v48 }
   0xd   :  { %251 = vst [vmem:[%s394_s3 + $0x10] sm:$0xff] %v223_v45   ;;  %v51_v57 = vmul.f32 %v286_v2, %v28_v44  ;;  %252 = vst [vmem:[%s394_s3 + $0x18] sm:$0xff] %v228_v50   ;;  %v85_v58 = vmax.f32 %v69_v51, 0.0  ;;  %v72_v59 = vadd.f32 %v293_v5, %v49_v52  ;;  %v52_v61 = vmul.f32 %v286_v2, %v29_v49 }
   0xe   :  { %v73_v60 = vadd.f32 %v293_v5, %v50_v53  ;;  %v86_v62 = vmax.f32 %v70_v55, 0.0  ;;  %v87_v63 = vmax.f32 %v71_v56, 0.0 }
   0xf   :  { %v74_v0 = vadd.f32 %v293_v5, %v51_v57  ;;  %v233_v1 = vpack.c.bf16 %v85_v58, %v84_v54  ;;  %v88_v3 = vmax.f32 %v72_v59, 0.0  ;;  %v75_v6 = vadd.f32 %v293_v5, %v52_v61 }
  0x10   :  { %v89_v4 = vmax.f32 %v73_v60, 0.0  ;;  %v238_v7 = vpack.c.bf16 %v87_v63, %v86_v62 }
  0x11   :  { %v90_v8 = vmax.f32 %v74_v0, 0.0  ;;  %253 = vst [vmem:[%s394_s3 + $0x20] sm:$0xff] %v233_v1   ;;  %v91_v10 = vmax.f32 %v75_v6, 0.0 }
  0x12   :  { %v243_v9 = vpack.c.bf16 %v89_v4, %v88_v3  ;;  %254 = vst [vmem:[%s394_s3 + $0x28] sm:$0xff] %v238_v7  }
  0x13   :  { %v248_v2 = vpack.c.bf16 %v91_v10, %v90_v8 }
  0x14   :  { %255 = vst [vmem:[%s394_s3 + $0x30] sm:$0xff] %v243_v9  }
  0x15   :  { %256 = vst [vmem:[%s394_s3 + $0x38] sm:$0xff] %v248_v2  }

// kernel: residual_block_forward.4
= control target key start
LH: loop header
LB: loop body
LE: loop exit
PB: predicated region body
PF: predicated region fallthrough
CT: control target
= control target key end

     0   :  { %vm119_vm0 = vcmask 1041408   ;;  %vm94_vm1 = vcmask 293888   ;;  %vm488_vm2 = vcmask 1040384   ;;  %vm491_vm3 = vcmask 1042432   ;;  %s810_s1 = inlined_call_operand.vmem [shape: bf16[36,128], index: 1, kind: input, shape index: {}]   ;;  %s811_s2 = inlined_call_operand.vmem [shape: bf16[36,128], index: 2, kind: input, shape index: {}]   ;;  %s812_s0 = inlined_call_operand.vmem [shape: bf16[128,36], index: 0, kind: input, shape index: {}]   ;;  %s813_s3 = inlined_call_operand.vmem [shape: f32[128,128], index: 3, kind: output, shape index: {0}]   ;;  %s814_s4 = inlined_call_operand.vmem [shape: f32[128,128], index: 4, kind: output, shape index: {1}]   ;;  %s815_s5 = inlined_call_operand.vmem [shape: f32[1,4,128], index: 5, kind: output, shape index: {2}]  }
   0x1   :  { %v604_v0 = vld [vmem:[%s810_s1 + $0x10] ss:$0 sps:$4 sm:$0x33]   ;;  %v606_v1 = vld [vmem:[%s810_s1 + $0x8] sm:$0xff]   ;;  %v608_v5 = vld [vmem:[%s810_s1] sm:$0xff]  }
   0x2   :  { %v605_v2 = vld [vmem:[%s811_s2 + $0x10] ss:$0 sps:$4 sm:$0x33]   ;;  %v607_v3 = vld [vmem:[%s811_s2 + $0x8] sm:$0xff]   ;;  %602 = vmatprep.subr.msk.bf16.mxu0 %vm119_vm0, %v604_v0  ;;  %v121_v4 = vsel %vm119_vm0, %v604_v0, 0  ;;  %v609_v7 = vld [vmem:[%s811_s2] sm:$0xff]  }
   0x3   :  { %603 = vmatprep.subr.msk.bf16.mxu1 %vm119_vm0, %v605_v2  ;;  %559 = vmatpush3.bf16.msra.mxu0 %v121_v4  ;;  %v241_v6 = vsel %vm119_vm0, %v605_v2, 0  ;;  %v610_v8 = vld [vmem:[%s812_s0] sm:$0xff]   ;;  %v611_v9 = vld [vmem:[%s812_s0 + $0x8] sm:$0xff]   ;;  %v612_v10 = vld [vmem:[%s812_s0 + $0x10] sm:$0xff]  }
   0x4   :  { %581 = vmatpush3.bf16.msra.mxu1 %v241_v6  ;;  %560 = vmatprep.subr.bf16.mxu0 %v606_v1  ;;  %v613_v11 = vld [vmem:[%s812_s0 + $0x18] sm:$0xff]   ;;  %v614_v12 = vld [vmem:[%s812_s0 + $0x20] sm:$0xff]   ;;  %v615_v13 = vld [vmem:[%s812_s0 + $0x28] sm:$0xff]  }
   0x5   :  { %582 = vmatprep.subr.bf16.mxu1 %v607_v3  ;;  %564 = vmatprep.mubr.msk.bf16.mxu0 %vm94_vm1, %v610_v8  ;;  %v616_v14 = vld [vmem:[%s812_s0 + $0x30] sm:$0xff]   ;;  %v617_v15 = vld [vmem:[%s812_s0 + $0x38] sm:$0xff]  }
   0x6   :  { %586 = vmatprep.mubr.msk.bf16.mxu1 %vm94_vm1, %v610_v8 }
   0x7   :  { %561 = vmatpush3.bf16.msra.mxu0 %v606_v1 }
   0x8   :  { %583 = vmatpush3.bf16.msra.mxu1 %v607_v3  ;;  %562 = vmatprep.subr.bf16.mxu0 %v608_v5 }
   0x9   :  { %584 = vmatprep.subr.bf16.mxu1 %v609_v7 }
   0xb   :  { %563 = vmatpush3.bf16.msra.mxu0 %v608_v5 }
   0xc   :  { %585 = vmatpush3.bf16.msra.mxu1 %v609_v7 }
   0xe   :  { %565 = vmatmul.mubr.msk.bf16.vlgmr.msra.gmra.mxu0 %vm94_vm1, %v611_v9 }
   0xf   :  { %587 = vmatmul.mubr.msk.bf16.vlgmr.msra.gmra.mxu1 %vm94_vm1, %v611_v9  ;;  %568 = vmatprep.mubr.msk.bf16.mxu0 %vm94_vm1, %v612_v10 }
  0x10   :  { %590 = vmatprep.mubr.msk.bf16.mxu1 %vm94_vm1, %v612_v10 }
  0x16   :  { %569 = vmatmul.mubr.msk.bf16.gmra.mxu0 %vm94_vm1, %v613_v11 }
  0x17   :  { %591 = vmatmul.mubr.msk.bf16.gmra.mxu1 %vm94_vm1, %v613_v11  ;;  %572 = vmatprep.mubr.msk.bf16.mxu0 %vm94_vm1, %v614_v12 }
  0x18   :  { %594 = vmatprep.mubr.msk.bf16.mxu1 %vm94_vm1, %v614_v12 }
  0x1e   :  { %573 = vmatmul.mubr.msk.bf16.gmra.mxu0 %vm94_vm1, %v615_v13 }
  0x1f   :  { %595 = vmatmul.mubr.msk.bf16.gmra.mxu1 %vm94_vm1, %v615_v13  ;;  %576 = vmatprep.mubr.msk.bf16.mxu0 %vm94_vm1, %v616_v14 }
  0x20   :  { %598 = vmatprep.mubr.msk.bf16.mxu1 %vm94_vm1, %v616_v14 }
  0x26   :  { %577 = vmatmul.mubr.msk.bf16.gmra.mxu0 %vm94_vm1, %v617_v15 }
  0x27   :  { %599 = vmatmul.mubr.msk.bf16.gmra.mxu1 %vm94_vm1, %v617_v15 }
  0xce   :  { %v566_v16 = vpop.f32.mrf.mxu0 }
  0xcf   :  { %342 = vst [vmem:[%s813_s3 + $0x10] sm:$0xff] %v566_v16  ;;  %v588_v17 = vpop.f32.mrf.mxu1  ;;  %v395_v31 = vmul.f32 %v566_v16, %v566_v16 }
  0xd0   :  { %358 = vst [vmem:[%s814_s4 + $0x10] sm:$0xff] %v588_v17  ;;  %v157_v18 = vpop.f32.mrf.mxu0  ;;  %v453_v35 = vmul.f32 %v588_v17, %v588_v17 }
  0xd1   :  { %340 = vst [vmem:[%s813_s3] sm:$0xff] %v157_v18  ;;  %v277_v19 = vpop.f32.mrf.mxu1  ;;  %v393_v23 = vmul.f32 %v157_v18, %v157_v18 }
  0xd2   :  { %356 = vst [vmem:[%s814_s4] sm:$0xff] %v277_v19  ;;  %v567_v20 = vpop.f32.mrf.mxu0  ;;  %v451_v27 = vmul.f32 %v277_v19, %v277_v19 }
  0xd3   :  { %343 = vst [vmem:[%s813_s3 + $0x18] sm:$0xff] %v567_v20  ;;  %v589_v21 = vpop.f32.mrf.mxu1  ;;  %v396_v39 = vmul.f32 %v567_v20, %v567_v20 }
  0xd4   :  { %359 = vst [vmem:[%s814_s4 + $0x18] sm:$0xff] %v589_v21  ;;  %v160_v22 = vpop.f32.mrf.mxu0  ;;  %v454_v43 = vmul.f32 %v589_v21, %v589_v21 }
  0xd5   :  { %341 = vst [vmem:[%s813_s3 + $0x8] sm:$0xff] %v160_v22  ;;  %v372_v24 = vadd.f32 %v160_v22, %v157_v18  ;;  %v394_v25 = vmul.f32 %v160_v22, %v160_v22  ;;  %v280_v26 = vpop.f32.mrf.mxu1 }
  0xd6   :  { %357 = vst [vmem:[%s814_s4 + $0x8] sm:$0xff] %v280_v26  ;;  %v430_v28 = vadd.f32 %v280_v26, %v277_v19  ;;  %v452_v29 = vmul.f32 %v280_v26, %v280_v26  ;;  %v570_v30 = vpop.f32.mrf.mxu0 }
  0xd7   :  { %v373_v32 = vadd.f32 %v566_v16, %v372_v24  ;;  %v409_v33 = vadd.f32 %v394_v25, %v393_v23  ;;  %346 = vst [vmem:[%s813_s3 + $0x30] sm:$0xff] %v570_v30  ;;  %v592_v34 = vpop.f32.mrf.mxu1  ;;  %v399_v63 = vmul.f32 %v570_v30, %v570_v30 }
  0xd8   :  { %v431_v36 = vadd.f32 %v588_v17, %v430_v28  ;;  %v467_v37 = vadd.f32 %v452_v29, %v451_v27  ;;  %362 = vst [vmem:[%s814_s4 + $0x30] sm:$0xff] %v592_v34  ;;  %v173_v38 = vpop.f32.mrf.mxu0  ;;  %v457_v3 = vmul.f32 %v592_v34, %v592_v34 }
  0xd9   :  { %v410_v40 = vadd.f32 %v409_v33, %v395_v31  ;;  %344 = vst [vmem:[%s813_s3 + $0x20] sm:$0xff] %v173_v38  ;;  %v374_v41 = vadd.f32 %v567_v20, %v373_v32  ;;  %v293_v42 = vpop.f32.mrf.mxu1  ;;  %v397_v48 = vmul.f32 %v173_v38, %v173_v38 }
  0xda   :  { %v468_v44 = vadd.f32 %v467_v37, %v453_v35  ;;  %360 = vst [vmem:[%s814_s4 + $0x20] sm:$0xff] %v293_v42  ;;  %v432_v45 = vadd.f32 %v589_v21, %v431_v36  ;;  %v571_v46 = vpop.f32.mrf.mxu0  ;;  %v455_v52 = vmul.f32 %v293_v42, %v293_v42 }
  0xdb   :  { %v375_v47 = vadd.f32 %v374_v41, %v173_v38  ;;  %v411_v49 = vadd.f32 %v410_v40, %v396_v39  ;;  %347 = vst [vmem:[%s813_s3 + $0x38] sm:$0xff] %v571_v46  ;;  %v593_v50 = vpop.f32.mrf.mxu1  ;;  %v400_v7 = vmul.f32 %v571_v46, %v571_v46 }
  0xdc   :  { %v433_v51 = vadd.f32 %v432_v45, %v293_v42  ;;  %v469_v53 = vadd.f32 %v468_v44, %v454_v43  ;;  %363 = vst [vmem:[%s814_s4 + $0x38] sm:$0xff] %v593_v50  ;;  %v176_v54 = vpop.f32.mrf.mxu0  ;;  %v458_v11 = vmul.f32 %v593_v50, %v593_v50 }
  0xdd   :  { %v412_v55 = vadd.f32 %v411_v49, %v397_v48  ;;  %345 = vst [vmem:[%s813_s3 + $0x28] sm:$0xff] %v176_v54  ;;  %v376_v56 = vadd.f32 %v375_v47, %v176_v54  ;;  %v398_v57 = vmul.f32 %v176_v54, %v176_v54  ;;  %v296_v58 = vpop.f32.mrf.mxu1 }
  0xde   :  { %v470_v59 = vadd.f32 %v469_v53, %v455_v52  ;;  %361 = vst [vmem:[%s814_s4 + $0x28] sm:$0xff] %v296_v58  ;;  %v434_v60 = vadd.f32 %v433_v51, %v296_v58  ;;  %v456_v61 = vmul.f32 %v296_v58, %v296_v58  ;;  %v574_v62 = vpop.f32.mrf.mxu0 }
  0xdf   :  { %v377_v0 = vadd.f32 %v570_v30, %v376_v56  ;;  %v413_v1 = vadd.f32 %v412_v55, %v398_v57  ;;  %350 = vst [vmem:[%s813_s3 + $0x50] sm:$0xff] %v574_v62  ;;  %v596_v2 = vpop.f32.mrf.mxu1  ;;  %v403_v31 = vmul.f32 %v574_v62, %v574_v62 }
  0xe0   :  { %v435_v4 = vadd.f32 %v592_v34, %v434_v60  ;;  %v471_v5 = vadd.f32 %v470_v59, %v456_v61  ;;  %366 = vst [vmem:[%s814_s4 + $0x50] sm:$0xff] %v596_v2  ;;  %v189_v6 = vpop.f32.mrf.mxu0  ;;  %v461_v35 = vmul.f32 %v596_v2, %v596_v2 }
  0xe1   :  { %v414_v8 = vadd.f32 %v413_v1, %v399_v63  ;;  %348 = vst [vmem:[%s813_s3 + $0x40] sm:$0xff] %v189_v6  ;;  %v378_v9 = vadd.f32 %v571_v46, %v377_v0  ;;  %v309_v10 = vpop.f32.mrf.mxu1  ;;  %v401_v16 = vmul.f32 %v189_v6, %v189_v6 }
  0xe2   :  { %v472_v12 = vadd.f32 %v471_v5, %v457_v3  ;;  %364 = vst [vmem:[%s814_s4 + $0x40] sm:$0xff] %v309_v10  ;;  %v436_v13 = vadd.f32 %v593_v50, %v435_v4  ;;  %v575_v14 = vpop.f32.mrf.mxu0  ;;  %v459_v20 = vmul.f32 %v309_v10, %v309_v10 }
  0xe3   :  { %v379_v15 = vadd.f32 %v378_v9, %v189_v6  ;;  %v415_v17 = vadd.f32 %v414_v8, %v400_v7  ;;  %351 = vst [vmem:[%s813_s3 + $0x58] sm:$0xff] %v575_v14  ;;  %v597_v18 = vpop.f32.mrf.mxu1  ;;  %v404_v39 = vmul.f32 %v575_v14, %v575_v14 }
  0xe4   :  { %v437_v19 = vadd.f32 %v436_v13, %v309_v10  ;;  %v473_v21 = vadd.f32 %v472_v12, %v458_v11  ;;  %367 = vst [vmem:[%s814_s4 + $0x58] sm:$0xff] %v597_v18  ;;  %v192_v22 = vpop.f32.mrf.mxu0  ;;  %v462_v43 = vmul.f32 %v597_v18, %v597_v18 }
  0xe5   :  { %v416_v23 = vadd.f32 %v415_v17, %v401_v16  ;;  %349 = vst [vmem:[%s813_s3 + $0x48] sm:$0xff] %v192_v22  ;;  %v380_v24 = vadd.f32 %v379_v15, %v192_v22  ;;  %v402_v25 = vmul.f32 %v192_v22, %v192_v22  ;;  %v312_v26 = vpop.f32.mrf.mxu1 }
  0xe6   :  { %v474_v27 = vadd.f32 %v473_v21, %v459_v20  ;;  %365 = vst [vmem:[%s814_s4 + $0x48] sm:$0xff] %v312_v26  ;;  %v438_v28 = vadd.f32 %v437_v19, %v312_v26  ;;  %v460_v29 = vmul.f32 %v312_v26, %v312_v26  ;;  %v578_v30 = vpop.f32.mrf.mxu0 }
  0xe7   :  { %v381_v32 = vadd.f32 %v574_v62, %v380_v24  ;;  %v417_v33 = vadd.f32 %v416_v23, %v402_v25  ;;  %354 = vst [vmem:[%s813_s3 + $0x70] sm:$0xff] %v578_v30  ;;  %v600_v34 = vpop.f32.mrf.mxu1  ;;  %v407_v62 = vmul.f32 %v578_v30, %v578_v30 }
  0xe8   :  { %v439_v36 = vadd.f32 %v596_v2, %v438_v28  ;;  %v475_v37 = vadd.f32 %v474_v27, %v460_v29  ;;  %370 = vst [vmem:[%s814_s4 + $0x70] sm:$0xff] %v600_v34  ;;  %v205_v38 = vpop.f32.mrf.mxu0  ;;  %v465_v1 = vmul.f32 %v600_v34, %v600_v34 }
  0xe9   :  { %v418_v40 = vadd.f32 %v417_v33, %v403_v31  ;;  %352 = vst [vmem:[%s813_s3 + $0x60] sm:$0xff] %v205_v38  ;;  %v382_v41 = vadd.f32 %v575_v14, %v381_v32  ;;  %v325_v42 = vpop.f32.mrf.mxu1  ;;  %v405_v48 = vmul.f32 %v205_v38, %v205_v38 }
  0xea   :  { %v476_v44 = vadd.f32 %v475_v37, %v461_v35  ;;  %368 = vst [vmem:[%s814_s4 + $0x60] sm:$0xff] %v325_v42  ;;  %v440_v45 = vadd.f32 %v597_v18, %v439_v36  ;;  %v579_v46 = vpop.f32.mrf.mxu0  ;;  %v463_v52 = vmul.f32 %v325_v42, %v325_v42 }
  0xeb   :  { %v383_v47 = vadd.f32 %v382_v41, %v205_v38  ;;  %v419_v49 = vadd.f32 %v418_v40, %v404_v39  ;;  %355 = vst [vmem:[%s813_s3 + $0x78] sm:$0xff] %v579_v46  ;;  %v601_v50 = vpop.f32.mrf.mxu1  ;;  %v408_v4 = vmul.f32 %v579_v46, %v579_v46 }
  0xec   :  { %v441_v51 = vadd.f32 %v440_v45, %v325_v42  ;;  %v477_v53 = vadd.f32 %v476_v44, %v462_v43  ;;  %371 = vst [vmem:[%s814_s4 + $0x78] sm:$0xff] %v601_v50  ;;  %v208_v54 = vpop.f32.mrf.mxu0  ;;  %v466_v7 = vmul.f32 %v601_v50, %v601_v50 }
  0xed   :  { %v420_v55 = vadd.f32 %v419_v49, %v405_v48  ;;  %353 = vst [vmem:[%s813_s3 + $0x68] sm:$0xff] %v208_v54  ;;  %v384_v56 = vadd.f32 %v383_v47, %v208_v54  ;;  %v406_v57 = vmul.f32 %v208_v54, %v208_v54  ;;  %v328_v58 = vpop.f32.mrf.mxu1 }
  0xee   :  { %v478_v59 = vadd.f32 %v477_v53, %v463_v52  ;;  %369 = vst [vmem:[%s814_s4 + $0x68] sm:$0xff] %v328_v58  ;;  %v442_v60 = vadd.f32 %v441_v51, %v328_v58  ;;  %v464_v61 = vmul.f32 %v328_v58, %v328_v58 }
  0xef   :  { %v385_v63 = vadd.f32 %v578_v30, %v384_v56  ;;  %v421_v0 = vadd.f32 %v420_v55, %v406_v57 }
  0xf0   :  { %v443_v2 = vadd.f32 %v600_v34, %v442_v60  ;;  %v479_v3 = vadd.f32 %v478_v59, %v464_v61 }
  0xf1   :  { %v386_v5 = vadd.f32 %v579_v46, %v385_v63  ;;  %v422_v6 = vadd.f32 %v421_v0, %v407_v62 }
  0xf2   :  { %v444_v8 = vadd.f32 %v601_v50, %v443_v2  ;;  %v480_v9 = vadd.f32 %v479_v3, %v465_v1 }
  0xf3   :  { %v387_v10 = vrot.slane %v386_v5, 4  ;;  %v423_v11 = vadd.f32 %v422_v6, %v408_v4 }
  0xf4   :  { %v445_v12 = vrot.slane %v444_v8, 4  ;;  %v481_v13 = vadd.f32 %v480_v9, %v466_v7 }
  0xf5   :  { %v388_v14 = vadd.f32 %v387_v10, %v386_v5  ;;  %v424_v15 = vrot.slane %v423_v11, 4 }
  0xf6   :  { %v446_v16 = vadd.f32 %v445_v12, %v444_v8  ;;  %v482_v17 = vrot.slane %v481_v13, 4 }
  0xf7   :  { %v389_v18 = vrot.slane %v388_v14, 2  ;;  %v425_v19 = vadd.f32 %v424_v15, %v423_v11 }
  0xf8   :  { %v447_v20 = vrot.slane %v446_v16, 2  ;;  %v483_v21 = vadd.f32 %v482_v17, %v481_v13 }
  0xf9   :  { %v390_v22 = vadd.f32 %v389_v18, %v388_v14  ;;  %v426_v23 = vrot.slane %v425_v19, 2 }
  0xfa   :  { %v448_v24 = vadd.f32 %v447_v20, %v446_v16  ;;  %v484_v25 = vrot.slane %v483_v21, 2 }
  0xfb   :  { %v391_v26 = vrot.slane %v390_v22, 1  ;;  %v427_v27 = vadd.f32 %v426_v23, %v425_v19 }
  0xfc   :  { %v449_v28 = vrot.slane %v448_v24, 1  ;;  %v485_v29 = vadd.f32 %v484_v25, %v483_v21 }
  0xfd   :  { %v428_v30 = vrot.slane %v427_v27, 1  ;;  %v392_v32 = vadd.f32 %v391_v26, %v390_v22 }
  0xfe   :  { %v486_v31 = vrot.slane %v485_v29, 1  ;;  %v450_v34 = vadd.f32 %v449_v28, %v448_v24 }
  0xff   :  { %v429_v33 = vadd.f32 %v428_v30, %v427_v27 }
 0x100   :  { %v487_v36 = vadd.f32 %v486_v31, %v485_v29 }
 0x101   :  { %v489_v35 = vsel %vm488_vm2, %v392_v32, %v429_v33 }
 0x102   :  { %v490_v37 = vsel %vm119_vm0, %v489_v35, %v450_v34 }
 0x103   :  { %v492_v38 = vsel %vm491_vm3, %v490_v37, %v487_v36 }
 0x104   :  { %493 = vst [vmem:[%s815_s5] sm:$0xf] %v492_v38 }

// kernel: residual_block_forward.7
= control target key start
LH: loop header
LB: loop body
LE: loop exit
PB: predicated region body
PF: predicated region fallthrough
CT: control target
= control target key end

     0   :  { %s466_s0 = inlined_call_operand.vmem [shape: f32[128,128], index: 0, kind: input, shape index: {}]   ;;  %s467_s1 = inlined_call_operand.vmem [shape: f32[128,128], index: 1, kind: input, shape index: {}]   ;;  %s468_s2 = inlined_call_operand.vmem [shape: f32[1,128], index: 2, kind: input, shape index: {}]   ;;  %s469_s3 = inlined_call_operand.vmem [shape: f32[1,128], index: 3, kind: input, shape index: {}]   ;;  %s470_s4 = inlined_call_operand.vmem [shape: f32[1,128], index: 4, kind: input, shape index: {}]   ;;  %s471_s5 = inlined_call_operand.vmem [shape: f32[1,128], index: 5, kind: input, shape index: {}]   ;;  %s472_s6 = inlined_call_operand.vmem [shape: f32[128,128], index: 6, kind: output, shape index: {}]  }
   0x1   :  { %v23_v0 = vld [vmem:[%s466_s0] sm:$0xff]  ;;  %v24_v8 = vld [vmem:[%s466_s0 + $0x8] sm:$0xff]  ;;  %v25_v10 = vld [vmem:[%s466_s0 + $0x10] sm:$0xff] }
   0x2   :  { %v244_v1 = vld [vmem:[%s468_s2] ss:$0 sm:$0xff]  ;;  %v86_v9 = vld [vmem:[%s467_s1 + $0x8] sm:$0xff]  ;;  %v87_v15 = vld [vmem:[%s467_s1 + $0x10] sm:$0xff] }
   0x3   :  { %v249_v2 = vld [vmem:[%s469_s3] ss:$0 sm:$0xff]  ;;  %v46_v3 = vmul.f32 %v244_v1, %v23_v0  ;;  %v47_v12 = vmul.f32 %v244_v1, %v24_v8  ;;  %v48_v14 = vmul.f32 %v244_v1, %v25_v10  ;;  %v26_v16 = vld [vmem:[%s466_s0 + $0x18] sm:$0xff]  ;;  %v28_v23 = vld [vmem:[%s466_s0 + $0x28] sm:$0xff] }
   0x4   :  { %v85_v4 = vld [vmem:[%s467_s1] sm:$0xff]  ;;  %v88_v17 = vld [vmem:[%s467_s1 + $0x18] sm:$0xff]  ;;  %v49_v19 = vmul.f32 %v244_v1, %v26_v16  ;;  %v90_v28 = vld [vmem:[%s467_s1 + $0x28] sm:$0xff]  ;;  %v51_v33 = vmul.f32 %v244_v1, %v28_v23 }
   0x5   :  { %v258_v5 = vld [vmem:[%s470_s4] ss:$0 sm:$0xff]  ;;  %v69_v11 = vadd.f32 %v249_v2, %v46_v3  ;;  %v70_v25 = vadd.f32 %v249_v2, %v47_v12  ;;  %v71_v26 = vadd.f32 %v249_v2, %v48_v14  ;;  %v29_v29 = vld [vmem:[%s466_s0 + $0x30] sm:$0xff]  ;;  %v30_v39 = vld [vmem:[%s466_s0 + $0x38] sm:$0xff] }
   0x6   :  { %v108_v6 = vmul.f32 %v258_v5, %v85_v4  ;;  %v264_v7 = vld [vmem:[%s471_s5] ss:$0 sm:$0xff]  ;;  %v109_v13 = vmul.f32 %v258_v5, %v86_v9  ;;  %v110_v18 = vmul.f32 %v258_v5, %v87_v15  ;;  %v111_v20 = vmul.f32 %v258_v5, %v88_v17  ;;  %v91_v30 = vld [vmem:[%s467_s1 + $0x30] sm:$0xff]  ;;  %v92_v44 = vld [vmem:[%s467_s1 + $0x38] sm:$0xff] }
   0x7   :  { %v27_v21 = vld [vmem:[%s466_s0 + $0x20] sm:$0xff]  ;;  %v72_v31 = vadd.f32 %v249_v2, %v49_v19  ;;  %v113_v34 = vmul.f32 %v258_v5, %v90_v28  ;;  %v74_v41 = vadd.f32 %v249_v2, %v51_v33  ;;  %v52_v42 = vmul.f32 %v244_v1, %v29_v29  ;;  %v32_v55 = vld [vmem:[%s466_s0 + $0x48] sm:$0xff]  ;;  %v33_v3 = vld [vmem:[%s466_s0 + $0x50] sm:$0xff] }
   0x8   :  { %v89_v22 = vld [vmem:[%s467_s1 + $0x20] sm:$0xff]  ;;  %v124_v24 = vadd.f32 %v108_v6, %v69_v11  ;;  %v50_v27 = vmul.f32 %v244_v1, %v27_v21  ;;  %v125_v36 = vadd.f32 %v109_v13, %v70_v25  ;;  %v126_v37 = vadd.f32 %v110_v18, %v71_v26  ;;  %v94_v60 = vld [vmem:[%s467_s1 + $0x48] sm:$0xff]  ;;  %v95_v4 = vld [vmem:[%s467_s1 + $0x50] sm:$0xff] }
   0x9   :  { %v112_v32 = vmul.f32 %v258_v5, %v89_v22  ;;  %v127_v40 = vadd.f32 %v111_v20, %v72_v31  ;;  %v114_v43 = vmul.f32 %v258_v5, %v91_v30  ;;  %v129_v50 = vadd.f32 %v113_v34, %v74_v41  ;;  %v31_v53 = vld [vmem:[%s466_s0 + $0x40] sm:$0xff]  ;;  %v34_v11 = vld [vmem:[%s466_s0 + $0x58] sm:$0xff]  ;;  %v36_v23 = vld [vmem:[%s466_s0 + $0x68] sm:$0xff] }
   0xa   :  { %v147_v35 = vadd.f32 %v264_v7, %v124_v24  ;;  %v73_v38 = vadd.f32 %v249_v2, %v50_v27  ;;  %v148_v46 = vadd.f32 %v264_v7, %v125_v36  ;;  %v149_v47 = vadd.f32 %v264_v7, %v126_v37  ;;  %v93_v54 = vld [vmem:[%s467_s1 + $0x40] sm:$0xff]  ;;  %v96_v12 = vld [vmem:[%s467_s1 + $0x58] sm:$0xff]  ;;  %v37_v33 = vld [vmem:[%s466_s0 + $0x70] sm:$0xff] }
   0xb   :  { %v150_v49 = vadd.f32 %v264_v7, %v127_v40  ;;  %v75_v51 = vadd.f32 %v249_v2, %v52_v42  ;;  %v53_v52 = vmul.f32 %v244_v1, %v30_v39  ;;  %v115_v59 = vmul.f32 %v258_v5, %v92_v44  ;;  %v35_v17 = vld [vmem:[%s466_s0 + $0x60] sm:$0xff]  ;;  %v99_v42 = vld [vmem:[%s467_s1 + $0x70] sm:$0xff] }
   0xc   :  { %v163_v45 = vmax.f32 %v147_v35, 0.0  ;;  %v128_v48 = vadd.f32 %v112_v32, %v73_v38  ;;  %v164_v56 = vmax.f32 %v148_v46, 0.0  ;;  %v165_v57 = vmax.f32 %v149_v47, 0.0  ;;  %v97_v22 = vld [vmem:[%s467_s1 + $0x60] sm:$0xff]  ;;  %v98_v32 = vld [vmem:[%s467_s1 + $0x68] sm:$0xff]  ;;  %v38_v47 = vld [vmem:[%s466_s0 + $0x78] sm:$0xff] }
   0xd   :  { %v166_v61 = vmax.f32 %v150_v49, 0.0  ;;  %v152_v62 = vadd.f32 %v264_v7, %v129_v50  ;;  %v130_v63 = vadd.f32 %v114_v43, %v75_v51  ;;  %v76_v0 = vadd.f32 %v249_v2, %v53_v52 }
   0xe   :  { %179 = vst [vmem:[%s472_s6] sm:$0xff] %v163_v45  ;;  %v151_v58 = vadd.f32 %v264_v7, %v128_v48  ;;  %180 = vst [vmem:[%s472_s6 + $0x8] sm:$0xff] %v164_v56  ;;  %v54_v8 = vmul.f32 %v244_v1, %v31_v53  ;;  %v116_v9 = vmul.f32 %v258_v5, %v93_v54  ;;  %v100_v48 = vld [vmem:[%s467_s1 + $0x78] sm:$0xff] }
   0xf   :  { %181 = vst [vmem:[%s472_s6 + $0x10] sm:$0xff] %v165_v57  ;;  %v55_v10 = vmul.f32 %v244_v1, %v32_v55  ;;  %182 = vst [vmem:[%s472_s6 + $0x18] sm:$0xff] %v166_v61  ;;  %v168_v13 = vmax.f32 %v152_v62, 0.0  ;;  %v153_v14 = vadd.f32 %v264_v7, %v130_v63  ;;  %v131_v15 = vadd.f32 %v115_v59, %v76_v0 }
  0x10   :  { %v167_v6 = vmax.f32 %v151_v58, 0.0  ;;  %v117_v16 = vmul.f32 %v258_v5, %v94_v60  ;;  %v77_v18 = vadd.f32 %v249_v2, %v54_v8  ;;  %v56_v20 = vmul.f32 %v244_v1, %v33_v3 }
  0x11   :  { %v78_v19 = vadd.f32 %v249_v2, %v55_v10  ;;  %v118_v21 = vmul.f32 %v258_v5, %v95_v4  ;;  %184 = vst [vmem:[%s472_s6 + $0x28] sm:$0xff] %v168_v13  ;;  %v169_v24 = vmax.f32 %v153_v14, 0.0  ;;  %v154_v25 = vadd.f32 %v264_v7, %v131_v15 }
  0x12   :  { %183 = vst [vmem:[%s472_s6 + $0x20] sm:$0xff] %v167_v6  ;;  %v57_v26 = vmul.f32 %v244_v1, %v34_v11  ;;  %v119_v27 = vmul.f32 %v258_v5, %v96_v12  ;;  %v132_v28 = vadd.f32 %v116_v9, %v77_v18  ;;  %v79_v30 = vadd.f32 %v249_v2, %v56_v20 }
  0x13   :  { %v133_v29 = vadd.f32 %v117_v16, %v78_v19  ;;  %v58_v31 = vmul.f32 %v244_v1, %v35_v17  ;;  %185 = vst [vmem:[%s472_s6 + $0x30] sm:$0xff] %v169_v24  ;;  %v170_v34 = vmax.f32 %v154_v25, 0.0  ;;  %v120_v36 = vmul.f32 %v258_v5, %v97_v22 }
  0x14   :  { %v80_v35 = vadd.f32 %v249_v2, %v57_v26  ;;  %v59_v37 = vmul.f32 %v244_v1, %v36_v23  ;;  %v155_v38 = vadd.f32 %v264_v7, %v132_v28  ;;  %v134_v40 = vadd.f32 %v118_v21, %v79_v30 }
  0x15   :  { %v156_v39 = vadd.f32 %v264_v7, %v133_v29  ;;  %v81_v41 = vadd.f32 %v249_v2, %v58_v31  ;;  %186 = vst [vmem:[%s472_s6 + $0x38] sm:$0xff] %v170_v34  ;;  %v121_v45 = vmul.f32 %v258_v5, %v98_v32  ;;  %v60_v46 = vmul.f32 %v244_v1, %v37_v33 }
  0x16   :  { %v135_v43 = vadd.f32 %v119_v27, %v80_v35  ;;  %v82_v44 = vadd.f32 %v249_v2, %v59_v37  ;;  %v171_v49 = vmax.f32 %v155_v38, 0.0  ;;  %v157_v51 = vadd.f32 %v264_v7, %v134_v40 }
  0x17   :  { %v172_v50 = vmax.f32 %v156_v39, 0.0  ;;  %v136_v52 = vadd.f32 %v120_v36, %v81_v41  ;;  %v83_v55 = vadd.f32 %v249_v2, %v60_v46  ;;  %v122_v56 = vmul.f32 %v258_v5, %v99_v42 }
  0x18   :  { %v158_v53 = vadd.f32 %v264_v7, %v135_v43  ;;  %v137_v54 = vadd.f32 %v121_v45, %v82_v44  ;;  %187 = vst [vmem:[%s472_s6 + $0x40] sm:$0xff] %v171_v49  ;;  %v173_v57 = vmax.f32 %v157_v51, 0.0  ;;  %v61_v59 = vmul.f32 %v244_v1, %v38_v47 }
  0x19   :  { %188 = vst [vmem:[%s472_s6 + $0x48] sm:$0xff] %v172_v50  ;;  %v159_v58 = vadd.f32 %v264_v7, %v136_v52  ;;  %v123_v60 = vmul.f32 %v258_v5, %v100_v48  ;;  %v138_v63 = vadd.f32 %v122_v56, %v83_v55 }
  0x1a   :  { %v174_v61 = vmax.f32 %v158_v53, 0.0  ;;  %v160_v62 = vadd.f32 %v264_v7, %v137_v54  ;;  %189 = vst [vmem:[%s472_s6 + $0x50] sm:$0xff] %v173_v57  ;;  %v84_v3 = vadd.f32 %v249_v2, %v61_v59 }
  0x1b   :  { %v175_v0 = vmax.f32 %v159_v58, 0.0  ;;  %v161_v1 = vadd.f32 %v264_v7, %v138_v63 }
  0x1c   :  { %190 = vst [vmem:[%s472_s6 + $0x58] sm:$0xff] %v174_v61  ;;  %v176_v4 = vmax.f32 %v160_v62, 0.0  ;;  %v139_v5 = vadd.f32 %v123_v60, %v84_v3 }
  0x1d   :  { %191 = vst [vmem:[%s472_s6 + $0x60] sm:$0xff] %v175_v0  ;;  %v177_v6 = vmax.f32 %v161_v1, 0.0 }
  0x1e   :  { %192 = vst [vmem:[%s472_s6 + $0x68] sm:$0xff] %v176_v4  ;;  %v162_v8 = vadd.f32 %v264_v7, %v139_v5 }
  0x1f   :  { %193 = vst [vmem:[%s472_s6 + $0x70] sm:$0xff] %v177_v6 }
  0x20   :  { %v178_v2 = vmax.f32 %v162_v8, 0.0 }
  0x22   :  { %194 = vst [vmem:[%s472_s6 + $0x78] sm:$0xff] %v178_v2 }

// kernel: residual_block_forward.6
= control target key start
LH: loop header
LB: loop body
LE: loop exit
PB: predicated region body
PF: predicated region fallthrough
CT: control target
= control target key end

     0   :  { %vm131_vm0 = vcmask 1043456   ;;  %vm106_vm1 = vcmask 588800   ;;  %vm306_vm2 = vcmask 1040384   ;;  %s520_s1 = inlined_call_operand.vmem [shape: bf16[72,128], index: 1, kind: input, shape index: {}]   ;;  %s521_s0 = inlined_call_operand.vmem [shape: bf16[128,72], index: 0, kind: input, shape index: {}]   ;;  %s522_s2 = inlined_call_operand.vmem [shape: f32[128,128], index: 2, kind: output, shape index: {0}]   ;;  %s523_s3 = inlined_call_operand.vmem [shape: f32[1,2,128], index: 3, kind: output, shape index: {1}]  }
   0x1   :  { %v389_v0 = vld [vmem:[%s520_s1 + $0x20] ss:$0 sps:$4 sm:$0xff]   ;;  %v390_v1 = vld [vmem:[%s520_s1 + $0x18] sm:$0xff]   ;;  %v391_v3 = vld [vmem:[%s520_s1 + $0x10] sm:$0xff]  }
   0x2   :  { %387 = vmatprep.subr.msk.bf16.mxu0 %vm131_vm0, %v389_v0  ;;  %v133_v2 = vsel %vm131_vm0, %v389_v0, 0  ;;  %388 = vmatprep.subr.msk.bf16.mxu1 %vm131_vm0, %v389_v0  ;;  %v394_v4 = vld [vmem:[%s521_s0] sm:$0xff]   ;;  %v392_v5 = vld [vmem:[%s520_s1 + $0x8] sm:$0xff]   ;;  %v396_v10 = vld [vmem:[%s521_s0 + $0x10] sm:$0xff]  }
   0x3   :  { %352 = vmatpush3.bf16.msra.mxu0 %v133_v2  ;;  %382 = vmatpush3.bf16.msra.mxu1 %v133_v2  ;;  %v398_v6 = vld [vmem:[%s521_s0 + $0x20] sm:$0xff]   ;;  %v395_v8 = vld [vmem:[%s521_s0 + $0x8] sm:$0xff]   ;;  %v400_v11 = vld [vmem:[%s521_s0 + $0x30] sm:$0xff]  }
   0x4   :  { %353 = vmatprep.subr.bf16.mxu0 %v390_v1  ;;  %378 = vmatprep.subr.bf16.mxu1 %v390_v1  ;;  %v393_v7 = vld [vmem:[%s520_s1] sm:$0xff]   ;;  %v399_v9 = vld [vmem:[%s521_s0 + $0x28] sm:$0xff]   ;;  %v397_v12 = vld [vmem:[%s521_s0 + $0x18] sm:$0xff]  }
   0x5   :  { %361 = vmatprep.mubr.msk.bf16.mxu0 %vm106_vm1, %v394_v4  ;;  %369 = vmatprep.mubr.msk.bf16.mxu1 %vm106_vm1, %v398_v6  ;;  %v401_v13 = vld [vmem:[%s521_s0 + $0x38] sm:$0xff]  }
   0x7   :  { %354 = vmatpush3.bf16.msra.mxu0 %v390_v1  ;;  %383 = vmatpush3.bf16.msra.mxu1 %v390_v1 }
   0x8   :  { %355 = vmatprep.subr.bf16.mxu0 %v391_v3  ;;  %379 = vmatprep.subr.bf16.mxu1 %v391_v3 }
   0xb   :  { %356 = vmatpush3.bf16.msra.mxu0 %v391_v3  ;;  %384 = vmatpush3.bf16.msra.mxu1 %v391_v3 }
   0xc   :  { %357 = vmatprep.subr.bf16.mxu0 %v392_v5  ;;  %380 = vmatprep.subr.bf16.mxu1 %v392_v5 }
   0xf   :  { %358 = vmatpush3.bf16.msra.mxu0 %v392_v5  ;;  %385 = vmatpush3.bf16.msra.mxu1 %v392_v5 }
  0x10   :  { %359 = vmatprep.subr.bf16.mxu0 %v393_v7  ;;  %381 = vmatprep.subr.bf16.mxu1 %v393_v7 }
  0x13   :  { %360 = vmatpush3.bf16.msra.mxu0 %v393_v7  ;;  %386 = vmatpush3.bf16.msra.mxu1 %v393_v7 }
  0x16   :  { %362 = vmatmul.mubr.msk.bf16.vlgmr.msra.gmra.mxu0 %vm106_vm1, %v395_v8  ;;  %370 = vmatmul.mubr.msk.bf16.vlgmr.msra.gmra.mxu1 %vm106_vm1, %v399_v9 }
  0x17   :  { %365 = vmatprep.mubr.msk.bf16.mxu0 %vm106_vm1, %v396_v10  ;;  %373 = vmatprep.mubr.msk.bf16.mxu1 %vm106_vm1, %v400_v11 }
  0x1e   :  { %366 = vmatmul.mubr.msk.bf16.gmra.mxu0 %vm106_vm1, %v397_v12  ;;  %374 = vmatmul.mubr.msk.bf16.gmra.mxu1 %vm106_vm1, %v401_v13 }
  0xd6   :  { %v363_v14 = vpop.f32.mrf.mxu0  ;;  %v371_v15 = vpop.f32.mrf.mxu1 }
  0xd7   :  { %234 = vst [vmem:[%s522_s2 + $0x10] sm:$0xff] %v363_v14  ;;  %242 = vst [vmem:[%s522_s2 + $0x50] sm:$0xff] %v371_v15  ;;  %v271_v27 = vmul.f32 %v363_v14, %v363_v14  ;;  %v279_v57 = vmul.f32 %v371_v15, %v371_v15 }
  0xd8   :  { %v169_v16 = vpop.f32.mrf.mxu0  ;;  %v201_v17 = vpop.f32.mrf.mxu1 }
  0xd9   :  { %232 = vst [vmem:[%s522_s2] sm:$0xff] %v169_v16  ;;  %240 = vst [vmem:[%s522_s2 + $0x40] sm:$0xff] %v201_v17  ;;  %v269_v22 = vmul.f32 %v169_v16, %v169_v16  ;;  %v277_v51 = vmul.f32 %v201_v17, %v201_v17 }
  0xda   :  { %v364_v18 = vpop.f32.mrf.mxu0  ;;  %v372_v19 = vpop.f32.mrf.mxu1 }
  0xdb   :  { %235 = vst [vmem:[%s522_s2 + $0x18] sm:$0xff] %v364_v18  ;;  %243 = vst [vmem:[%s522_s2 + $0x58] sm:$0xff] %v372_v19  ;;  %v272_v32 = vmul.f32 %v364_v18, %v364_v18  ;;  %v280_v60 = vmul.f32 %v372_v19, %v372_v19 }
  0xdc   :  { %v172_v20 = vpop.f32.mrf.mxu0  ;;  %v204_v21 = vpop.f32.mrf.mxu1 }
  0xdd   :  { %233 = vst [vmem:[%s522_s2 + $0x8] sm:$0xff] %v172_v20  ;;  %v248_v23 = vadd.f32 %v172_v20, %v169_v16  ;;  %v270_v24 = vmul.f32 %v172_v20, %v172_v20  ;;  %241 = vst [vmem:[%s522_s2 + $0x48] sm:$0xff] %v204_v21  ;;  %v278_v55 = vmul.f32 %v204_v21, %v204_v21 }
  0xde   :  { %v367_v25 = vpop.f32.mrf.mxu0  ;;  %v375_v26 = vpop.f32.mrf.mxu1 }
  0xdf   :  { %v249_v28 = vadd.f32 %v363_v14, %v248_v23  ;;  %v285_v29 = vadd.f32 %v270_v24, %v269_v22  ;;  %238 = vst [vmem:[%s522_s2 + $0x30] sm:$0xff] %v367_v25  ;;  %246 = vst [vmem:[%s522_s2 + $0x70] sm:$0xff] %v375_v26  ;;  %v275_v45 = vmul.f32 %v367_v25, %v367_v25 }
  0xe0   :  { %v185_v30 = vpop.f32.mrf.mxu0  ;;  %v217_v31 = vpop.f32.mrf.mxu1  ;;  %v283_v5 = vmul.f32 %v375_v26, %v375_v26 }
  0xe1   :  { %v286_v33 = vadd.f32 %v285_v29, %v271_v27  ;;  %236 = vst [vmem:[%s522_s2 + $0x20] sm:$0xff] %v185_v30  ;;  %v250_v34 = vadd.f32 %v364_v18, %v249_v28  ;;  %244 = vst [vmem:[%s522_s2 + $0x60] sm:$0xff] %v217_v31  ;;  %v273_v38 = vmul.f32 %v185_v30, %v185_v30 }
  0xe2   :  { %v368_v35 = vpop.f32.mrf.mxu0  ;;  %v376_v36 = vpop.f32.mrf.mxu1  ;;  %v281_v0 = vmul.f32 %v217_v31, %v217_v31 }
  0xe3   :  { %v251_v37 = vadd.f32 %v250_v34, %v185_v30  ;;  %v287_v39 = vadd.f32 %v286_v33, %v272_v32  ;;  %239 = vst [vmem:[%s522_s2 + $0x38] sm:$0xff] %v368_v35  ;;  %247 = vst [vmem:[%s522_s2 + $0x78] sm:$0xff] %v376_v36  ;;  %v276_v48 = vmul.f32 %v368_v35, %v368_v35 }
  0xe4   :  { %v188_v40 = vpop.f32.mrf.mxu0  ;;  %v220_v41 = vpop.f32.mrf.mxu1  ;;  %v284_v8 = vmul.f32 %v376_v36, %v376_v36 }
  0xe5   :  { %v288_v42 = vadd.f32 %v287_v39, %v273_v38  ;;  %237 = vst [vmem:[%s522_s2 + $0x28] sm:$0xff] %v188_v40  ;;  %v252_v43 = vadd.f32 %v251_v37, %v188_v40  ;;  %v274_v44 = vmul.f32 %v188_v40, %v188_v40  ;;  %245 = vst [vmem:[%s522_s2 + $0x68] sm:$0xff] %v220_v41 }
  0xe6   :  { %v282_v4 = vmul.f32 %v220_v41, %v220_v41 }
  0xe7   :  { %v253_v46 = vadd.f32 %v367_v25, %v252_v43  ;;  %v289_v47 = vadd.f32 %v288_v42, %v274_v44 }
  0xe9   :  { %v254_v49 = vadd.f32 %v368_v35, %v253_v46  ;;  %v290_v50 = vadd.f32 %v289_v47, %v275_v45 }
  0xeb   :  { %v291_v52 = vadd.f32 %v290_v50, %v276_v48  ;;  %v255_v53 = vadd.f32 %v254_v49, %v201_v17 }
  0xed   :  { %v256_v54 = vadd.f32 %v255_v53, %v204_v21  ;;  %v292_v56 = vadd.f32 %v291_v52, %v277_v51 }
  0xef   :  { %v257_v58 = vadd.f32 %v371_v15, %v256_v54  ;;  %v293_v59 = vadd.f32 %v292_v56, %v278_v55 }
  0xf1   :  { %v294_v61 = vadd.f32 %v293_v59, %v279_v57  ;;  %v258_v62 = vadd.f32 %v372_v19, %v257_v58 }
  0xf3   :  { %v259_v63 = vadd.f32 %v258_v62, %v217_v31  ;;  %v295_v1 = vadd.f32 %v294_v61, %v280_v60 }
  0xf5   :  { %v296_v2 = vadd.f32 %v295_v1, %v281_v0  ;;  %v260_v3 = vadd.f32 %v259_v63, %v220_v41 }
  0xf7   :  { %v261_v6 = vadd.f32 %v375_v26, %v260_v3  ;;  %v297_v7 = vadd.f32 %v296_v2, %v282_v4 }
  0xf9   :  { %v262_v9 = vadd.f32 %v376_v36, %v261_v6  ;;  %v298_v10 = vadd.f32 %v297_v7, %v283_v5 }
  0xfb   :  { %v263_v11 = vrot.slane %v262_v9, 4  ;;  %v299_v12 = vadd.f32 %v298_v10, %v284_v8 }
  0xfd   :  { %v264_v13 = vadd.f32 %v263_v11, %v262_v9  ;;  %v300_v14 = vrot.slane %v299_v12, 4 }
  0xff   :  { %v265_v15 = vrot.slane %v264_v13, 2  ;;  %v301_v16 = vadd.f32 %v300_v14, %v299_v12 }
 0x101   :  { %v266_v17 = vadd.f32 %v265_v15, %v264_v13  ;;  %v302_v18 = vrot.slane %v301_v16, 2 }
 0x103   :  { %v267_v19 = vrot.slane %v266_v17, 1  ;;  %v303_v20 = vadd.f32 %v302_v18, %v301_v16 }
 0x105   :  { %v304_v21 = vrot.slane %v303_v20, 1  ;;  %v268_v22 = vadd.f32 %v267_v19, %v266_v17 }
 0x107   :  { %v305_v23 = vadd.f32 %v304_v21, %v303_v20 }
 0x109   :  { %v307_v24 = vsel %vm306_vm2, %v268_v22, %v305_v23 }
 0x10a   :  { %308 = vst [vmem:[%s523_s3] sm:$0x3] %v307_v24 }

</bundles_post_ra>
